<compile_context>
chip_gen: v6e
topology: v6e:2x2x1
jax: 0.10.0
libtpu: 0.0.40
codegen_flags: <defaults>
</compile_context>

<pallas_src>
import functools

import jax
import jax.numpy as jnp
from jax.experimental import pallas as pl
from jax.experimental.pallas import tpu as pltpu


def _round_up(n, m):
    return ((n + m - 1) // m) * m


def mlp_kernel(x_ref, w1_ref, b1_ref, w2_ref, b2_ref, o_ref):
    # Fused: x @ W1 + b1 -> ReLU -> @ W2 + b2.  Both dots accumulate in f32 on the MXU;
    # the bias broadcast-adds and ReLU run on the VPU (free slots in this mem-bound regime).
    x = x_ref[...]                                                      # (TB, F)
    h = jnp.dot(x, w1_ref[...], preferred_element_type=jnp.float32)    # (TB, H) f32
    h = jnp.maximum(h + b1_ref[...], 0.0)                               # bias + ReLU
    out = jnp.dot(h, w2_ref[...], preferred_element_type=jnp.float32)  # (TB, C) f32
    o_ref[...] = (out + b2_ref[...]).astype(o_ref.dtype)


@functools.partial(jax.jit, static_argnames=("block_b",))
def mlp_forward(x, w1, b1, w2, b2, *, block_b=2048):
    """Forward pass of mlp_torch.

    x:  (B, ...) -> flattened to (B, features)
    w1: (features, hidden), b1: (hidden,)
    w2: (hidden, classes),  b2: (classes,)
    returns (B, classes) float32.
    """
    B = x.shape[0]
    x2d = x.reshape(B, -1).astype(jnp.float32)      # nn.Flatten() (+ no-op cast if already f32)
    F = x2d.shape[1]
    H = w1.shape[1]
    C = w2.shape[1]

    w1f = w1.astype(jnp.float32)
    b1f = b1.reshape(1, H).astype(jnp.float32)
    w2f = w2.astype(jnp.float32)
    b2f = b2.reshape(1, C).astype(jnp.float32)

    # Batch tile: multiple of 8 (sublane), capped at the (rounded-up) batch size.
    SUB = 8
    TB = min(_round_up(max(block_b, SUB), SUB), _round_up(max(B, 1), SUB))
    grid = (pl.cdiv(B, TB),)

    cost = pl.CostEstimate(
        flops=2 * B * (F * H + H * C),
        transcendentals=0,
        bytes_accessed=4 * (B * F + B * C + F * H + H * C + H + C),
    )

    out = pl.pallas_call(
        mlp_kernel,
        out_shape=jax.ShapeDtypeStruct((B, C), jnp.float32),
        grid=grid,
        in_specs=[
            pl.BlockSpec((TB, F), lambda i: (i, 0)),   # x tile marches over batch
            pl.BlockSpec((F, H), lambda i: (0, 0)),    # W1 VMEM-resident across steps
            pl.BlockSpec((1, H), lambda i: (0, 0)),    # b1 resident
            pl.BlockSpec((H, C), lambda i: (0, 0)),    # W2 resident
            pl.BlockSpec((1, C), lambda i: (0, 0)),    # b2 resident
        ],
        out_specs=pl.BlockSpec((TB, C), lambda i: (i, 0)),
        compiler_params=pltpu.CompilerParams(
            dimension_semantics=("parallel",)),        # shard batch tiles across TCs
        cost_estimate=cost,
    )(x2d, w1f, b1f, w2f, b2f)

    return out


def make_params(key, features=39, hidden=32, classes=10):
    # Deterministic synthetic params (PyTorch-like uniform init ranges).
    k1, k2, k3, k4 = jax.random.split(key, 4)
    lim1 = 1.0 / jnp.sqrt(features)
    lim2 = 1.0 / jnp.sqrt(hidden)
    w1 = jax.random.uniform(k1, (features, hidden), jnp.float32, -lim1, lim1)
    b1 = jax.random.uniform(k2, (hidden,), jnp.float32, -lim1, lim1)
    w2 = jax.random.uniform(k3, (hidden, classes), jnp.float32, -lim2, lim2)
    b2 = jax.random.uniform(k4, (classes,), jnp.float32, -lim2, lim2)
    return w1, b1, w2, b2


if __name__ == "__main__":
    key = jax.random.PRNGKey(0)
    kx, kx2, kp = jax.random.split(key, 3)

    B, F, H, C = 8, 39, 32, 10
    w1, b1, w2, b2 = make_params(kp, F, H, C)

    # Small-batch run (single tile) + exact reference check.
    x = jax.random.normal(kx, (B, F), jnp.float32)
    out = jax.block_until_ready(mlp_forward(x, w1, b1, w2, b2))
    ref = jnp.maximum(x @ w1 + b1, 0.0) @ w2 + b2
    assert out.shape == (B, C)
    assert jnp.allclose(out, ref, atol=1e-4, rtol=1e-4)

    # Larger batch exercising multiple batch tiles + a partial last tile
    # (B=2056, TB=2048 -> grid=2, last tile has 8 valid rows).
    B2 = 2056
    x2 = jax.random.normal(kx2, (B2, F), jnp.float32)
    out2 = jax.block_until_ready(mlp_forward(x2, w1, b1, w2, b2))
    ref2 = jnp.maximum(x2 @ w1 + b1, 0.0) @ w2 + b2
    assert out2.shape == (B2, C)
    assert jnp.allclose(out2, ref2, atol=1e-4, rtol=1e-4)

    print("KERNEL_OK")
</pallas_src>

<mosaic_0001>
module attributes {stable_mosaic.version = 11 : i64} {
  func.func @mlp_kernel(%arg0: i32, %arg1: memref<8x39xf32, #tpu.memory_space<vmem>>, %arg2: memref<39x32xf32, #tpu.memory_space<vmem>>, %arg3: memref<1x32xf32, #tpu.memory_space<vmem>>, %arg4: memref<32x10xf32, #tpu.memory_space<vmem>>, %arg5: memref<1x10xf32, #tpu.memory_space<vmem>>, %arg6: memref<8x10xf32, #tpu.memory_space<vmem>>) attributes {dimension_semantics = [#tpu.dimension_semantics<parallel>], iteration_bounds = array<i64: 1>, scalar_prefetch = 0 : i64, scratch_operands = 0 : i64, tpu.core_type = #tpu.core_type<tc>, window_params = [{transform_indices = @transform_0, window_bounds = array<i64: 8, 39>}, {pipeline_mode = #tpu.pipeline_mode<synchronous>, transform_indices = @transform_1, window_bounds = array<i64: 39, 32>}, {pipeline_mode = #tpu.pipeline_mode<synchronous>, transform_indices = @transform_2, window_bounds = array<i64: 1, 32>}, {pipeline_mode = #tpu.pipeline_mode<synchronous>, transform_indices = @transform_3, window_bounds = array<i64: 32, 10>}, {pipeline_mode = #tpu.pipeline_mode<synchronous>, transform_indices = @transform_4, window_bounds = array<i64: 1, 10>}, {transform_indices = @transform_5, window_bounds = array<i64: 8, 10>}]} {
    %c0 = arith.constant 0 : index
    %c0_0 = arith.constant 0 : index
    %0 = vector.load %arg1[%c0, %c0_0] : memref<8x39xf32, #tpu.memory_space<vmem>>, vector<8x39xf32>
    %c0_1 = arith.constant 0 : index
    %c0_2 = arith.constant 0 : index
    %1 = vector.load %arg2[%c0_1, %c0_2] : memref<39x32xf32, #tpu.memory_space<vmem>>, vector<39x32xf32>
    %cst = arith.constant dense<0.000000e+00> : vector<8x32xf32>
    %2 = tpu.matmul %0, %1, %cst {dimension_numbers = #tpu.dot_dimension_numbers<[1], [0], [0], [1], [0, 0, 1, 1], [], []>} : vector<8x39xf32>, vector<39x32xf32>, vector<8x32xf32> -> vector<8x32xf32>
    %c0_3 = arith.constant 0 : index
    %c0_4 = arith.constant 0 : index
    %3 = vector.load %arg3[%c0_3, %c0_4] : memref<1x32xf32, #tpu.memory_space<vmem>>, vector<1x32xf32>
    %4 = vector.broadcast %3 : vector<1x32xf32> to vector<8x32xf32>
    %5 = arith.addf %2, %4 : vector<8x32xf32>
    %cst_5 = arith.constant 0.000000e+00 : f32
    %6 = vector.broadcast %cst_5 : f32 to vector<8x32xf32>
    %7 = arith.maximumf %5, %6 : vector<8x32xf32>
    %c0_6 = arith.constant 0 : index
    %c0_7 = arith.constant 0 : index
    %8 = vector.load %arg4[%c0_6, %c0_7] : memref<32x10xf32, #tpu.memory_space<vmem>>, vector<32x10xf32>
    %cst_8 = arith.constant dense<0.000000e+00> : vector<8x10xf32>
    %9 = tpu.matmul %7, %8, %cst_8 {dimension_numbers = #tpu.dot_dimension_numbers<[1], [0], [0], [1], [0, 0, 1, 1], [], []>} : vector<8x32xf32>, vector<32x10xf32>, vector<8x10xf32> -> vector<8x10xf32>
    %c0_9 = arith.constant 0 : index
    %c0_10 = arith.constant 0 : index
    %10 = vector.load %arg5[%c0_9, %c0_10] : memref<1x10xf32, #tpu.memory_space<vmem>>, vector<1x10xf32>
    %11 = vector.broadcast %10 : vector<1x10xf32> to vector<8x10xf32>
    %12 = arith.addf %9, %11 : vector<8x10xf32>
    %c0_11 = arith.constant 0 : index
    %c0_12 = arith.constant 0 : index
    %13 = vector.load %arg6[%c0_11, %c0_12] : memref<8x10xf32, #tpu.memory_space<vmem>>, vector<8x10xf32>
    tpu.vector_store %arg6[%c0_11, %c0_12], %12 {strides = array<i32>} : memref<8x10xf32, #tpu.memory_space<vmem>>, vector<8x10xf32>,
    return
  }
  func.func @transform_0(%arg0: i32) -> (i32, i32) {
    %c0_i32 = arith.constant 0 : i32
    %c0_i32_0 = arith.constant 0 : i32
    return %arg0, %c0_i32 : i32, i32
  }
  func.func @transform_1(%arg0: i32) -> (i32, i32) {
    %c0_i32 = arith.constant 0 : i32
    %c0_i32_0 = arith.constant 0 : i32
    %c0_i32_1 = arith.constant 0 : i32
    return %c0_i32, %c0_i32_0 : i32, i32
  }
  func.func @transform_2(%arg0: i32) -> (i32, i32) {
    %c0_i32 = arith.constant 0 : i32
    %c0_i32_0 = arith.constant 0 : i32
    %c0_i32_1 = arith.constant 0 : i32
    return %c0_i32, %c0_i32_0 : i32, i32
  }
  func.func @transform_3(%arg0: i32) -> (i32, i32) {
    %c0_i32 = arith.constant 0 : i32
    %c0_i32_0 = arith.constant 0 : i32
    %c0_i32_1 = arith.constant 0 : i32
    return %c0_i32, %c0_i32_0 : i32, i32
  }
  func.func @transform_4(%arg0: i32) -> (i32, i32) {
    %c0_i32 = arith.constant 0 : i32
    %c0_i32_0 = arith.constant 0 : i32
    %c0_i32_1 = arith.constant 0 : i32
    return %c0_i32, %c0_i32_0 : i32, i32
  }
  func.func @transform_5(%arg0: i32) -> (i32, i32) {
    %c0_i32 = arith.constant 0 : i32
    %c0_i32_0 = arith.constant 0 : i32
    return %arg0, %c0_i32 : i32, i32
  }
}

</mosaic_0001>

<bundles_post_ra>
// kernel: mlp_forward.1
= control target key start
LH: loop header
LB: loop body
LE: loop exit
PB: predicated region body
PF: predicated region fallthrough
CT: control target
= control target key end

     0   :  { %vm38_vm0 = vcmask 1046528   ;;  %v279_v1 = vmov 0.0   ;;  %vm280_vm1 = vmmov 0   ;;  %s351_s0 = inlined_call_operand.vmem [shape: f32[8,39], index: 0, kind: input, shape index: {}]   ;;  %s352_s1 = inlined_call_operand.vmem [shape: f32[39,32], index: 1, kind: input, shape index: {}]   ;;  %s353_s2 = inlined_call_operand.vmem [shape: f32[1,32], index: 2, kind: input, shape index: {}]   ;;  %s354_s3 = inlined_call_operand.vmem [shape: f32[32,10], index: 3, kind: input, shape index: {}]   ;;  %s355_s4 = inlined_call_operand.vmem [shape: f32[1,10], index: 4, kind: input, shape index: {}]   ;;  %s356_s5 = inlined_call_operand.hbm [shape: f32[8,10], index: 5, kind: output, shape index: {}]  }
   0x1   :  { %v26_v0 = vld [vmem:[%s352_s1 + $0x20] sm:$0x7f]  ;;  %230 = vmatprep.subr.mxu0 %v279_v1  ;;  %v25_v2 = vld [vmem:[%s352_s1 + $0x18] sm:$0xff]  ;;  %243 = vmatprep.subr.mxu1 %v279_v1 }
   0x2   :  { %231 = vmatpush3.msk.msra.mxu0 %vm38_vm0, %v26_v0  ;;  %240 = vmatprep.mubr.msk.f32.mxu0 %vm280_vm1, %v279_v1  ;;  %v116_v3 = vld [vmem:[%s354_s3 + $0x18] sm:$0xff] }
   0x3   :  { %10 = vsyncpa [#allocation3], 0  ;;  %232 = vmatprep.subr.mxu0 %v279_v1  ;;  %v24_v4 = vld [vmem:[%s352_s1 + $0x10] sm:$0xff]  ;;  %244 = vmatpush3.msra.mxu1 %v116_v3  ;;  %v23_v5 = vld [vmem:[%s352_s1 + $0x8] sm:$0xff]  ;;  %vm34_vm2 = vcmask 318464   ;;  %vm124_vm3 = vcmask 261120  }
   0x4   :  { %233 = vmatpush3.msra.mxu0 %v25_v2  ;;  %245 = vmatprep.subr.mxu1 %v279_v1  ;;  %v22_v6 = vld [vmem:[%s352_s1] sm:$0xff]  ;;  %v115_v8 = vld [vmem:[%s354_s3 + $0x10] sm:$0xff]  ;;  %v114_v9 = vld [vmem:[%s354_s3 + $0x8] sm:$0xff]  ;;  %s281_s15 = smov [#allocation2]   ;;  %vm198_vm4 = vcmask 80896  }
   0x5   :  { %234 = vmatprep.subr.mxu0 %v279_v1  ;;  %251 = vmatprep.mubr.msk.f32.mxu1 %vm280_vm1, %v279_v1  ;;  %v21_v7 = vld [vmem:[%s351_s0] sm:$0xff]  ;;  %s206_s16 = sshll.u32 %s281_s15, 4  ;;  %s207_s16 = int_to_ptr.vmem [resolvable:$true] %s206_s16 }
   0x6   :  { %235 = vmatpush3.msra.mxu0 %v24_v4  ;;  %246 = vmatpush3.msra.mxu1 %v115_v8  ;;  %v113_v10 = vld [vmem:[%s354_s3] sm:$0xff]  ;;  %s257_s3 = scalar_lea.vmem %s207_s16, 128  ;;  %p262_p1 = scmp.lt.s32.totalorder %s207_s16, %s207_s16 }
   0x7   :  { %236 = vmatprep.subr.mxu0 %v279_v1  ;;  %247 = vmatprep.subr.mxu1 %v279_v1  ;;  %v214_v11 = vld [vmem:[%s353_s2] ss:$0 sm:$0xff]  ;;  %p258_p0 = scmp.ne.s32.totalorder %s207_s16, %s257_s3  ;;  %p263_p2 = scmp.lt.s32.totalorder %s257_s3, %s257_s3 }
   0x8   :  { %237 = vmatpush3.msra.mxu0 %v23_v5  ;;  %248 = vmatpush3.msra.mxu1 %v114_v9  ;;  %v217_v16 = vld [vmem:[%s355_s4] ss:$0 sm:$0xff] }
   0x9   :  { %238 = vmatprep.subr.mxu0 %v279_v1  ;;  %249 = vmatprep.subr.mxu1 %v279_v1  ;;  %p264_p3 = por %p263_p2, %p262_p1 }
   0xa   :  { %239 = vmatpush3.msra.mxu0 %v22_v6  ;;  %250 = vmatpush3.msra.mxu1 %v113_v10 }
   0xb   :  { %241 = vmatmul.mubr.msk.f32.vlgmr.msra.gmra.mxu0 %vm34_vm2, %v21_v7  ;;  %p265_p4 = pnand %p264_p3, %p258_p0 }
  0xcb   :  { %v108_v12 = vpop.f32.mrf.mxu0 }
  0xcc   :  { %v109_v13 = vadd.f32 %v214_v11, %v108_v12 }
  0xcd   :  { %v242_v14 = vpop.f32.mrf.mxu0 }
  0xce   :  { %v112_v15 = vmax.f32 %v109_v13, 0.0 }
  0xd0   :  { %252 = vmatmul.mubr.msk.f32.vlgmr.msra.gmra.mxu1 %vm124_vm3, %v112_v15 }
 0x190   :  { %v194_v17 = vpop.f32.mrf.mxu1 }
 0x191   :  { %v195_v18 = vadd.f32 %v217_v16, %v194_v17 }
 0x192   :  { %v253_v19 = vpop.f32.mrf.mxu1 }
 0x193   :  { %199 = vst.msk [vmem:[#allocation2] sm:$0xff] %vm198_vm4, %v195_v18 }
 0x194   :  { %268 = shalt.err (!%p265_p4)
}
 0x195   :  { %209 = dma.vmem_to_hbm [thread:$0]  %s207_s16, 128, %s356_s5, [#allocation3]  }
 0x196   :  { %277 = dma.done.wait [#allocation3], 128  }
 0x197   :  { %278 = vsyncadd [#allocation3], 4294967168 }
 0x198   :  { %213 = vsyncpa [#allocation3], 1 }

</bundles_post_ra>
